<compile_context>
chip_gen: v7x
topology: tpu7x:2x2x1
jax: 0.10.0
libtpu: 0.0.40
codegen_flags: <defaults>
</compile_context>

<pallas_src>
import functools
import math

import jax
import jax.numpy as jnp
from jax.experimental import pallas as pl
from jax.experimental.pallas import tpu as pltpu


def mha_kernel(xq_ref, xk_ref, xv_ref, mask_ref,
               wq_ref, wk_ref, wv_ref, wfc_ref,
               out_ref, attn_ref, *, n_heads, d_att):
    H, A = n_heads, d_att
    Bt, S, D = xq_ref.shape
    HA = H * A
    N = Bt * S
    cdt = wq_ref.dtype            # compute dtype for MXU operands (bf16 on TPU, f32 otherwise)

    xq = xq_ref[...]              # [Bt, S, D] f32, kept for the residual / LayerNorm path
    xq_c = xq.reshape(N, D).astype(cdt)
    xk_c = xk_ref[...].reshape(N, D)      # already in cdt
    xv_c = xv_ref[...].reshape(N, D)

    # Fused Q/K/V projections on the flattened [Bt*S, D] slab (fat MXU M dimension).
    q = jnp.dot(xq_c, wq_ref[...], preferred_element_type=jnp.float32)   # [N, HA] f32
    k = jnp.dot(xk_c, wk_ref[...], preferred_element_type=jnp.float32)
    v = jnp.dot(xv_c, wv_ref[...], preferred_element_type=jnp.float32)

    # Fold 1/sqrt(d_att) into q (f32, before the cast) instead of scaling [H, S, S].
    scale = 1.0 / math.sqrt(A)
    q = (q * scale).astype(cdt).reshape(Bt, S, HA)
    k = k.astype(cdt).reshape(Bt, S, HA)          # cast BEFORE the layout transposes
    v = v.astype(cdt).reshape(Bt, S, HA)

    # Additive mask bias (int8 0/1 -> f32 * -1e9), hoisted out of all per-head work.
    # NOTE: bias-add instead of masked_fill; identical after softmax unless an entire
    # query row is masked (same degenerate caveat as the reference).
    bias = mask_ref[...].astype(jnp.float32) * (-1000000000.0)           # [Bt, S, S]

    ctx_list = []
    for b in range(Bt):           # static, small loop over the batch block
        # Head-major layouts via one 2D transpose + free leading-dim reshape each.
        qT = q[b].T.reshape(H, A, S)              # qT[h, a, s] = q[s, h*A + a]
        kT = k[b].T.reshape(H, A, S)
        vT = v[b].T.reshape(H, A, S)

        # All heads' QK^T in ONE batched MXU op: contract A (dim 1 of both) -> [H,Sq,Sk].
        s = jax.lax.dot_general(qT, kT, (((1,), (1,)), ((0,), (0,))),
                                preferred_element_type=jnp.float32)
        s = s + bias[b][None, :, :]

        # Softmax over keys in f32; exact divide so attention rows sum to 1.
        m = jnp.max(s, axis=-1, keepdims=True)
        e = jnp.exp(s - m)
        l = jnp.sum(e, axis=-1, keepdims=True)
        p = e / l                                 # [H, Sq, Sk]
        attn_ref[b] = p.astype(attn_ref.dtype)

        # Context, transposed per head: [H,A,Sk] x [H,Sq,Sk] -> [H,A,Sq] (one batched op).
        ctxT = jax.lax.dot_general(vT, p.astype(cdt), (((2,), (2,)), ((0,), (0,))),
                                   preferred_element_type=jnp.float32)
        ctx_list.append(ctxT.astype(cdt).reshape(HA, S).T)   # [Sq, HA], col order h*A + a

    ctx = ctx_list[0] if Bt == 1 else jnp.concatenate(ctx_list, axis=0)  # [N, HA] cdt

    # Single fused output projection (K = H*A) on the flattened slab.
    o = jnp.dot(ctx, wfc_ref[...], preferred_element_type=jnp.float32).reshape(Bt, S, D)

    # Residual + LayerNorm(d_model), gamma=1, beta=0, eps=1e-5 (all f32).
    y = o + xq
    mean = jnp.mean(y, axis=-1, keepdims=True)
    yc = y - mean
    var = jnp.mean(yc * yc, axis=-1, keepdims=True)
    out_ref[...] = yc * jax.lax.rsqrt(var + 1e-5)


def _pick_block_b(B, S, target_rows=128):
    """Largest divisor of B such that Bt*S stays near the MXU row target."""
    want = max(1, target_rows // max(S, 1))
    best = 1
    for d in range(1, B + 1):
        if B % d == 0 and d <= want:
            best = d
    return best


def multi_head_attention(xq, xk, xv, attn_mask, wq, wk, wv, wfc, *, n_heads, d_att):
    B, S, D = xq.shape
    HA = n_heads * d_att
    Bt = _pick_block_b(B, S)
    grid_b = B // Bt

    # bf16 MXU operands only on a real TPU backend; f32 otherwise (CPU/interpret cannot
    # execute bf16 x bf16 -> f32 dots).
    on_tpu = jax.default_backend() == "tpu"
    cdt = jnp.bfloat16 if on_tpu else jnp.float32

    mask_i8 = attn_mask.astype(jnp.int8)          # 0/1, 4x less HBM than f32
    xk_c = xk.astype(cdt)                         # K/V only ever used as MXU operands
    xv_c = xv.astype(cdt)
    wq_c = wq.astype(cdt)
    wk_c = wk.astype(cdt)
    wv_c = wv.astype(cdt)
    wfc_c = wfc.astype(cdt)

    kernel = functools.partial(mha_kernel, n_heads=n_heads, d_att=d_att)

    out, attn = pl.pallas_call(
        kernel,
        out_shape=(
            jax.ShapeDtypeStruct((B, S, D), jnp.float32),
            jax.ShapeDtypeStruct((B, n_heads, S, S), cdt),
        ),
        grid_spec=pltpu.PrefetchScalarGridSpec(
            num_scalar_prefetch=0,
            grid=(grid_b,),
            in_specs=[
                pl.BlockSpec((Bt, S, D), lambda b: (b, 0, 0)),           # input_Q (f32)
                pl.BlockSpec((Bt, S, D), lambda b: (b, 0, 0)),           # input_K (cdt)
                pl.BlockSpec((Bt, S, D), lambda b: (b, 0, 0)),           # input_V (cdt)
                pl.BlockSpec((Bt, S, S), lambda b: (b, 0, 0)),           # attn_mask (int8)
                pl.BlockSpec((D, HA), lambda b: (0, 0)),                 # W_Q^T
                pl.BlockSpec((D, HA), lambda b: (0, 0)),                 # W_K^T
                pl.BlockSpec((D, HA), lambda b: (0, 0)),                 # W_V^T
                pl.BlockSpec((HA, D), lambda b: (0, 0)),                 # W_fc^T
            ],
            out_specs=[
                pl.BlockSpec((Bt, S, D), lambda b: (b, 0, 0)),
                pl.BlockSpec((Bt, n_heads, S, S), lambda b: (b, 0, 0, 0)),
            ],
        ),
        compiler_params=pltpu.CompilerParams(
            dimension_semantics=("parallel",),
            vmem_limit_bytes=48 * 1024 * 1024,   # <=48 MiB: safe on v7x, useful on v5e/v6e
        ),
    )(xq, xk_c, xv_c, mask_i8, wq_c, wk_c, wv_c, wfc_c)
    return out, attn


def reference(xq, xk, xv, attn_mask, wq, wk, wv, wfc, n_heads, d_att):
    """Pure-JAX (f32) mirror of the PyTorch forward, for verification."""
    B, S, D = xq.shape
    q = (xq @ wq).reshape(B, S, n_heads, d_att).transpose(0, 2, 1, 3)
    k = (xk @ wk).reshape(B, S, n_heads, d_att).transpose(0, 2, 1, 3)
    v = (xv @ wv).reshape(B, S, n_heads, d_att).transpose(0, 2, 1, 3)
    scores = jnp.einsum('bhqd,bhkd->bhqk', q, k) / jnp.sqrt(float(d_att))
    scores = jnp.where(attn_mask[:, None, :, :], -1000000000.0, scores)
    attn = jax.nn.softmax(scores, axis=-1)
    ctx = jnp.einsum('bhqk,bhkd->bhqd', attn, v).transpose(0, 2, 1, 3).reshape(B, S, -1)
    out = ctx @ wfc + xq
    mean = out.mean(-1, keepdims=True)
    var = ((out - mean) ** 2).mean(-1, keepdims=True)
    return (out - mean) / jnp.sqrt(var + 1e-5), attn


if __name__ == "__main__":
    B, S = 2, 8
    d_model, d_att, n_heads = 32, 8, 4
    HA = n_heads * d_att

    key = jax.random.PRNGKey(0)
    k_xq, k_xk, k_xv, k_wq, k_wk, k_wv, k_fc = jax.random.split(key, 7)

    input_Q = jax.random.normal(k_xq, (B, S, d_model), jnp.float32)
    input_K = jax.random.normal(k_xk, (B, S, d_model), jnp.float32)
    input_V = jax.random.normal(k_xv, (B, S, d_model), jnp.float32)

    # nn.Linear(bias=False) weights, stored transposed as [in, out].
    bound_in = 1.0 / math.sqrt(d_model)
    bound_fc = 1.0 / math.sqrt(HA)
    W_Q = jax.random.uniform(k_wq, (d_model, HA), jnp.float32, -bound_in, bound_in)
    W_K = jax.random.uniform(k_wk, (d_model, HA), jnp.float32, -bound_in, bound_in)
    W_V = jax.random.uniform(k_wv, (d_model, HA), jnp.float32, -bound_in, bound_in)
    W_fc = jax.random.uniform(k_fc, (HA, d_model), jnp.float32, -bound_fc, bound_fc)

    # Padding-style mask: last 2 key positions masked for every query.
    attn_mask = jnp.broadcast_to(jnp.arange(S)[None, None, :] >= S - 2, (B, S, S))

    out, attn = multi_head_attention(
        input_Q, input_K, input_V, attn_mask,
        W_Q, W_K, W_V, W_fc, n_heads=n_heads, d_att=d_att)
    out = jax.block_until_ready(out)
    attn = jax.block_until_ready(attn)

    out_ref, attn_ref = reference(
        input_Q, input_K, input_V, attn_mask,
        W_Q, W_K, W_V, W_fc, n_heads, d_att)

    assert out.shape == (B, S, d_model)
    assert attn.shape == (B, n_heads, S, S)
    # Tolerances cover the bf16 MXU-operand path on real TPUs (reference is f32).
    assert jnp.allclose(out, out_ref, atol=2e-2, rtol=2e-2)
    assert jnp.allclose(attn.astype(jnp.float32), attn_ref, atol=2e-2, rtol=2e-2)

    print("KERNEL_OK")
</pallas_src>

<mosaic_0001>
module attributes {stable_mosaic.version = 11 : i64} {
  func.func @mha_kernel(%arg0: i32, %arg1: memref<2x8x32xf32, #tpu.memory_space<vmem>>, %arg2: memref<2x8x32xf32, #tpu.memory_space<vmem>>, %arg3: memref<2x8x32xf32, #tpu.memory_space<vmem>>, %arg4: memref<2x8x8xi8, #tpu.memory_space<vmem>>, %arg5: memref<32x32xf32, #tpu.memory_space<vmem>>, %arg6: memref<32x32xf32, #tpu.memory_space<vmem>>, %arg7: memref<32x32xf32, #tpu.memory_space<vmem>>, %arg8: memref<32x32xf32, #tpu.memory_space<vmem>>, %arg9: memref<2x8x32xf32, #tpu.memory_space<vmem>>, %arg10: memref<2x4x8x8xf32, #tpu.memory_space<vmem>>) attributes {dimension_semantics = [#tpu.dimension_semantics<parallel>], iteration_bounds = array<i64: 1>, scalar_prefetch = 0 : i64, scratch_operands = 0 : i64, tpu.core_type = #tpu.core_type<tc>, window_params = [{transform_indices = @transform_0, window_bounds = array<i64: 2, 8, 32>}, {transform_indices = @transform_1, window_bounds = array<i64: 2, 8, 32>}, {transform_indices = @transform_2, window_bounds = array<i64: 2, 8, 32>}, {transform_indices = @transform_3, window_bounds = array<i64: 2, 8, 8>}, {pipeline_mode = #tpu.pipeline_mode<synchronous>, transform_indices = @transform_4, window_bounds = array<i64: 32, 32>}, {pipeline_mode = #tpu.pipeline_mode<synchronous>, transform_indices = @transform_5, window_bounds = array<i64: 32, 32>}, {pipeline_mode = #tpu.pipeline_mode<synchronous>, transform_indices = @transform_6, window_bounds = array<i64: 32, 32>}, {pipeline_mode = #tpu.pipeline_mode<synchronous>, transform_indices = @transform_7, window_bounds = array<i64: 32, 32>}, {transform_indices = @transform_8, window_bounds = array<i64: 2, 8, 32>}, {transform_indices = @transform_9, window_bounds = array<i64: 2, 4, 8, 8>}]} {
    %c0 = arith.constant 0 : index
    %c0_0 = arith.constant 0 : index
    %c0_1 = arith.constant 0 : index
    %0 = vector.load %arg1[%c0, %c0_0, %c0_1] : memref<2x8x32xf32, #tpu.memory_space<vmem>>, vector<2x8x32xf32>
    %1 = vector.shape_cast %0 : vector<2x8x32xf32> to vector<16x32xf32>
    %c0_2 = arith.constant 0 : index
    %c0_3 = arith.constant 0 : index
    %c0_4 = arith.constant 0 : index
    %2 = vector.load %arg2[%c0_2, %c0_3, %c0_4] : memref<2x8x32xf32, #tpu.memory_space<vmem>>, vector<2x8x32xf32>
    %3 = vector.shape_cast %2 : vector<2x8x32xf32> to vector<16x32xf32>
    %c0_5 = arith.constant 0 : index
    %c0_6 = arith.constant 0 : index
    %c0_7 = arith.constant 0 : index
    %4 = vector.load %arg3[%c0_5, %c0_6, %c0_7] : memref<2x8x32xf32, #tpu.memory_space<vmem>>, vector<2x8x32xf32>
    %5 = vector.shape_cast %4 : vector<2x8x32xf32> to vector<16x32xf32>
    %c0_8 = arith.constant 0 : index
    %c0_9 = arith.constant 0 : index
    %6 = vector.load %arg5[%c0_8, %c0_9] : memref<32x32xf32, #tpu.memory_space<vmem>>, vector<32x32xf32>
    %cst = arith.constant dense<0.000000e+00> : vector<16x32xf32>
    %7 = tpu.matmul %1, %6, %cst {dimension_numbers = #tpu.dot_dimension_numbers<[1], [0], [0], [1], [0, 0, 1, 1], [], []>} : vector<16x32xf32>, vector<32x32xf32>, vector<16x32xf32> -> vector<16x32xf32>
    %c0_10 = arith.constant 0 : index
    %c0_11 = arith.constant 0 : index
    %8 = vector.load %arg6[%c0_10, %c0_11] : memref<32x32xf32, #tpu.memory_space<vmem>>, vector<32x32xf32>
    %cst_12 = arith.constant dense<0.000000e+00> : vector<16x32xf32>
    %9 = tpu.matmul %3, %8, %cst_12 {dimension_numbers = #tpu.dot_dimension_numbers<[1], [0], [0], [1], [0, 0, 1, 1], [], []>} : vector<16x32xf32>, vector<32x32xf32>, vector<16x32xf32> -> vector<16x32xf32>
    %c0_13 = arith.constant 0 : index
    %c0_14 = arith.constant 0 : index
    %10 = vector.load %arg7[%c0_13, %c0_14] : memref<32x32xf32, #tpu.memory_space<vmem>>, vector<32x32xf32>
    %cst_15 = arith.constant dense<0.000000e+00> : vector<16x32xf32>
    %11 = tpu.matmul %5, %10, %cst_15 {dimension_numbers = #tpu.dot_dimension_numbers<[1], [0], [0], [1], [0, 0, 1, 1], [], []>} : vector<16x32xf32>, vector<32x32xf32>, vector<16x32xf32> -> vector<16x32xf32>
    %cst_16 = arith.constant 0.353553385 : f32
    %12 = vector.broadcast %cst_16 : f32 to vector<16x32xf32>
    %13 = arith.mulf %7, %12 : vector<16x32xf32>
    %14 = vector.shape_cast %13 : vector<16x32xf32> to vector<2x8x32xf32>
    %15 = vector.shape_cast %9 : vector<16x32xf32> to vector<2x8x32xf32>
    %16 = vector.shape_cast %11 : vector<16x32xf32> to vector<2x8x32xf32>
    %c0_17 = arith.constant 0 : index
    %c0_18 = arith.constant 0 : index
    %c0_19 = arith.constant 0 : index
    %17 = vector.load %arg4[%c0_17, %c0_18, %c0_19] : memref<2x8x8xi8, #tpu.memory_space<vmem>>, vector<2x8x8xi8>
    %18 = arith.sitofp %17 : vector<2x8x8xi8> to vector<2x8x8xf32>
    %cst_20 = arith.constant -1.000000e+09 : f32
    %19 = vector.broadcast %cst_20 : f32 to vector<2x8x8xf32>
    %20 = arith.mulf %18, %19 : vector<2x8x8xf32>
    %21 = vector.extract_strided_slice %14 {offsets = [0, 0, 0], sizes = [1, 8, 32], strides = [1, 1, 1]} : vector<2x8x32xf32> to vector<1x8x32xf32>
    %22 = vector.shape_cast %21 : vector<1x8x32xf32> to vector<8x32xf32>
    %23 = tpu.transpose %22, [1, 0] : vector<8x32xf32> -> vector<32x8xf32>
    %24 = vector.shape_cast %23 : vector<32x8xf32> to vector<4x8x8xf32>
    %25 = vector.extract_strided_slice %15 {offsets = [0, 0, 0], sizes = [1, 8, 32], strides = [1, 1, 1]} : vector<2x8x32xf32> to vector<1x8x32xf32>
    %26 = vector.shape_cast %25 : vector<1x8x32xf32> to vector<8x32xf32>
    %27 = tpu.transpose %26, [1, 0] : vector<8x32xf32> -> vector<32x8xf32>
    %28 = vector.shape_cast %27 : vector<32x8xf32> to vector<4x8x8xf32>
    %29 = vector.extract_strided_slice %16 {offsets = [0, 0, 0], sizes = [1, 8, 32], strides = [1, 1, 1]} : vector<2x8x32xf32> to vector<1x8x32xf32>
    %30 = vector.shape_cast %29 : vector<1x8x32xf32> to vector<8x32xf32>
    %31 = tpu.transpose %30, [1, 0] : vector<8x32xf32> -> vector<32x8xf32>
    %32 = vector.shape_cast %31 : vector<32x8xf32> to vector<4x8x8xf32>
    %cst_21 = arith.constant dense<0.000000e+00> : vector<4x8x8xf32>
    %33 = tpu.matmul %24, %28, %cst_21 {dimension_numbers = #tpu.dot_dimension_numbers<[1], [1], [2], [2], [0, 0, 0, 2, 1, 2], [0], [0]>} : vector<4x8x8xf32>, vector<4x8x8xf32>, vector<4x8x8xf32> -> vector<4x8x8xf32>
    %34 = vector.extract_strided_slice %20 {offsets = [0, 0, 0], sizes = [1, 8, 8], strides = [1, 1, 1]} : vector<2x8x8xf32> to vector<1x8x8xf32>
    %35 = vector.shape_cast %34 : vector<1x8x8xf32> to vector<8x8xf32>
    %36 = vector.shape_cast %35 : vector<8x8xf32> to vector<1x8x8xf32>
    %37 = vector.broadcast %36 : vector<1x8x8xf32> to vector<4x8x8xf32>
    %38 = arith.addf %33, %37 : vector<4x8x8xf32>
    %cst_22 = arith.constant dense<0xFF800000> : vector<4x8xf32>
    %39 = vector.multi_reduction <maximumf>, %38, %cst_22 [2] : vector<4x8x8xf32> to vector<4x8xf32>
    %40 = vector.shape_cast %39 : vector<4x8xf32> to vector<4x8x1xf32>
    %41 = vector.broadcast %40 : vector<4x8x1xf32> to vector<4x8x8xf32>
    %42 = arith.subf %38, %41 : vector<4x8x8xf32>
    %43 = math.exp %42 : vector<4x8x8xf32>
    %cst_23 = arith.constant dense<0.000000e+00> : vector<4x8xf32>
    %44 = vector.multi_reduction <add>, %43, %cst_23 [2] : vector<4x8x8xf32> to vector<4x8xf32>
    %45 = vector.shape_cast %44 : vector<4x8xf32> to vector<4x8x1xf32>
    %46 = vector.broadcast %45 : vector<4x8x1xf32> to vector<4x8x8xf32>
    %47 = arith.divf %43, %46 : vector<4x8x8xf32>
    %c0_24 = arith.constant 0 : index
    %c0_25 = arith.constant 0 : index
    %c0_26 = arith.constant 0 : index
    %c0_27 = arith.constant 0 : index
    %48 = vector.load %arg10[%c0_24, %c0_25, %c0_26, %c0_27] : memref<2x4x8x8xf32, #tpu.memory_space<vmem>>, vector<1x4x8x8xf32>
    %49 = vector.shape_cast %48 : vector<1x4x8x8xf32> to vector<4x8x8xf32>
    %50 = vector.shape_cast %47 : vector<4x8x8xf32> to vector<1x4x8x8xf32>
    tpu.vector_store %arg10[%c0_24, %c0_25, %c0_26, %c0_27], %50 {strides = array<i32>} : memref<2x4x8x8xf32, #tpu.memory_space<vmem>>, vector<1x4x8x8xf32>,
    %cst_28 = arith.constant dense<0.000000e+00> : vector<4x8x8xf32>
    %51 = tpu.matmul %32, %47, %cst_28 {dimension_numbers = #tpu.dot_dimension_numbers<[2], [2], [1], [1], [0, 0, 0, 1, 1, 1], [0], [0]>} : vector<4x8x8xf32>, vector<4x8x8xf32>, vector<4x8x8xf32> -> vector<4x8x8xf32>
    %52 = vector.shape_cast %51 : vector<4x8x8xf32> to vector<32x8xf32>
    %53 = tpu.transpose %52, [1, 0] : vector<32x8xf32> -> vector<8x32xf32>
    %54 = vector.extract_strided_slice %14 {offsets = [1, 0, 0], sizes = [1, 8, 32], strides = [1, 1, 1]} : vector<2x8x32xf32> to vector<1x8x32xf32>
    %55 = vector.shape_cast %54 : vector<1x8x32xf32> to vector<8x32xf32>
    %56 = tpu.transpose %55, [1, 0] : vector<8x32xf32> -> vector<32x8xf32>
    %57 = vector.shape_cast %56 : vector<32x8xf32> to vector<4x8x8xf32>
    %58 = vector.extract_strided_slice %15 {offsets = [1, 0, 0], sizes = [1, 8, 32], strides = [1, 1, 1]} : vector<2x8x32xf32> to vector<1x8x32xf32>
    %59 = vector.shape_cast %58 : vector<1x8x32xf32> to vector<8x32xf32>
    %60 = tpu.transpose %59, [1, 0] : vector<8x32xf32> -> vector<32x8xf32>
    %61 = vector.shape_cast %60 : vector<32x8xf32> to vector<4x8x8xf32>
    %62 = vector.extract_strided_slice %16 {offsets = [1, 0, 0], sizes = [1, 8, 32], strides = [1, 1, 1]} : vector<2x8x32xf32> to vector<1x8x32xf32>
    %63 = vector.shape_cast %62 : vector<1x8x32xf32> to vector<8x32xf32>
    %64 = tpu.transpose %63, [1, 0] : vector<8x32xf32> -> vector<32x8xf32>
    %65 = vector.shape_cast %64 : vector<32x8xf32> to vector<4x8x8xf32>
    %cst_29 = arith.constant dense<0.000000e+00> : vector<4x8x8xf32>
    %66 = tpu.matmul %57, %61, %cst_29 {dimension_numbers = #tpu.dot_dimension_numbers<[1], [1], [2], [2], [0, 0, 0, 2, 1, 2], [0], [0]>} : vector<4x8x8xf32>, vector<4x8x8xf32>, vector<4x8x8xf32> -> vector<4x8x8xf32>
    %67 = vector.extract_strided_slice %20 {offsets = [1, 0, 0], sizes = [1, 8, 8], strides = [1, 1, 1]} : vector<2x8x8xf32> to vector<1x8x8xf32>
    %68 = vector.shape_cast %67 : vector<1x8x8xf32> to vector<8x8xf32>
    %69 = vector.shape_cast %68 : vector<8x8xf32> to vector<1x8x8xf32>
    %70 = vector.broadcast %69 : vector<1x8x8xf32> to vector<4x8x8xf32>
    %71 = arith.addf %66, %70 : vector<4x8x8xf32>
    %cst_30 = arith.constant dense<0xFF800000> : vector<4x8xf32>
    %72 = vector.multi_reduction <maximumf>, %71, %cst_30 [2] : vector<4x8x8xf32> to vector<4x8xf32>
    %73 = vector.shape_cast %72 : vector<4x8xf32> to vector<4x8x1xf32>
    %74 = vector.broadcast %73 : vector<4x8x1xf32> to vector<4x8x8xf32>
    %75 = arith.subf %71, %74 : vector<4x8x8xf32>
    %76 = math.exp %75 : vector<4x8x8xf32>
    %cst_31 = arith.constant dense<0.000000e+00> : vector<4x8xf32>
    %77 = vector.multi_reduction <add>, %76, %cst_31 [2] : vector<4x8x8xf32> to vector<4x8xf32>
    %78 = vector.shape_cast %77 : vector<4x8xf32> to vector<4x8x1xf32>
    %79 = vector.broadcast %78 : vector<4x8x1xf32> to vector<4x8x8xf32>
    %80 = arith.divf %76, %79 : vector<4x8x8xf32>
    %c1 = arith.constant 1 : index
    %c0_32 = arith.constant 0 : index
    %c0_33 = arith.constant 0 : index
    %c0_34 = arith.constant 0 : index
    %81 = vector.load %arg10[%c1, %c0_32, %c0_33, %c0_34] : memref<2x4x8x8xf32, #tpu.memory_space<vmem>>, vector<1x4x8x8xf32>
    %82 = vector.shape_cast %81 : vector<1x4x8x8xf32> to vector<4x8x8xf32>
    %83 = vector.shape_cast %80 : vector<4x8x8xf32> to vector<1x4x8x8xf32>
    tpu.vector_store %arg10[%c1, %c0_32, %c0_33, %c0_34], %83 {strides = array<i32>} : memref<2x4x8x8xf32, #tpu.memory_space<vmem>>, vector<1x4x8x8xf32>,
    %cst_35 = arith.constant dense<0.000000e+00> : vector<4x8x8xf32>
    %84 = tpu.matmul %65, %80, %cst_35 {dimension_numbers = #tpu.dot_dimension_numbers<[2], [2], [1], [1], [0, 0, 0, 1, 1, 1], [0], [0]>} : vector<4x8x8xf32>, vector<4x8x8xf32>, vector<4x8x8xf32> -> vector<4x8x8xf32>
    %85 = vector.shape_cast %84 : vector<4x8x8xf32> to vector<32x8xf32>
    %86 = tpu.transpose %85, [1, 0] : vector<32x8xf32> -> vector<8x32xf32>
    %87 = tpu.concatenate %53, %86 in 0 : vector<8x32xf32>, vector<8x32xf32> -> vector<16x32xf32>
    %c0_36 = arith.constant 0 : index
    %c0_37 = arith.constant 0 : index
    %88 = vector.load %arg8[%c0_36, %c0_37] : memref<32x32xf32, #tpu.memory_space<vmem>>, vector<32x32xf32>
    %cst_38 = arith.constant dense<0.000000e+00> : vector<16x32xf32>
    %89 = tpu.matmul %87, %88, %cst_38 {dimension_numbers = #tpu.dot_dimension_numbers<[1], [0], [0], [1], [0, 0, 1, 1], [], []>} : vector<16x32xf32>, vector<32x32xf32>, vector<16x32xf32> -> vector<16x32xf32>
    %90 = vector.shape_cast %89 : vector<16x32xf32> to vector<2x8x32xf32>
    %91 = arith.addf %90, %0 : vector<2x8x32xf32>
    %cst_39 = arith.constant dense<0.000000e+00> : vector<2x8xf32>
    %92 = vector.multi_reduction <add>, %91, %cst_39 [2] : vector<2x8x32xf32> to vector<2x8xf32>
    %93 = vector.shape_cast %92 : vector<2x8xf32> to vector<2x8x1xf32>
    %cst_40 = arith.constant 3.200000e+01 : f32
    %94 = vector.broadcast %cst_40 : f32 to vector<2x8x1xf32>
    %95 = arith.divf %93, %94 : vector<2x8x1xf32>
    %96 = vector.broadcast %95 : vector<2x8x1xf32> to vector<2x8x32xf32>
    %97 = arith.subf %91, %96 : vector<2x8x32xf32>
    %98 = arith.mulf %97, %97 : vector<2x8x32xf32>
    %cst_41 = arith.constant dense<0.000000e+00> : vector<2x8xf32>
    %99 = vector.multi_reduction <add>, %98, %cst_41 [2] : vector<2x8x32xf32> to vector<2x8xf32>
    %100 = vector.shape_cast %99 : vector<2x8xf32> to vector<2x8x1xf32>
    %cst_42 = arith.constant 3.200000e+01 : f32
    %101 = vector.broadcast %cst_42 : f32 to vector<2x8x1xf32>
    %102 = arith.divf %100, %101 : vector<2x8x1xf32>
    %cst_43 = arith.constant 9.99999974E-6 : f32
    %103 = vector.broadcast %cst_43 : f32 to vector<2x8x1xf32>
    %104 = arith.addf %102, %103 : vector<2x8x1xf32>
    %105 = math.rsqrt %104 : vector<2x8x1xf32>
    %106 = vector.broadcast %105 : vector<2x8x1xf32> to vector<2x8x32xf32>
    %107 = arith.mulf %97, %106 : vector<2x8x32xf32>
    %c0_44 = arith.constant 0 : index
    %c0_45 = arith.constant 0 : index
    %c0_46 = arith.constant 0 : index
    %108 = vector.load %arg9[%c0_44, %c0_45, %c0_46] : memref<2x8x32xf32, #tpu.memory_space<vmem>>, vector<2x8x32xf32>
    tpu.vector_store %arg9[%c0_44, %c0_45, %c0_46], %107 {strides = array<i32>} : memref<2x8x32xf32, #tpu.memory_space<vmem>>, vector<2x8x32xf32>,
    return
  }
  func.func @transform_0(%arg0: i32) -> (i32, i32, i32) {
    %c0_i32 = arith.constant 0 : i32
    %c0_i32_0 = arith.constant 0 : i32
    %c0_i32_1 = arith.constant 0 : i32
    return %arg0, %c0_i32, %c0_i32_0 : i32, i32, i32
  }
  func.func @transform_1(%arg0: i32) -> (i32, i32, i32) {
    %c0_i32 = arith.constant 0 : i32
    %c0_i32_0 = arith.constant 0 : i32
    %c0_i32_1 = arith.constant 0 : i32
    return %arg0, %c0_i32, %c0_i32_0 : i32, i32, i32
  }
  func.func @transform_2(%arg0: i32) -> (i32, i32, i32) {
    %c0_i32 = arith.constant 0 : i32
    %c0_i32_0 = arith.constant 0 : i32
    %c0_i32_1 = arith.constant 0 : i32
    return %arg0, %c0_i32, %c0_i32_0 : i32, i32, i32
  }
  func.func @transform_3(%arg0: i32) -> (i32, i32, i32) {
    %c0_i32 = arith.constant 0 : i32
    %c0_i32_0 = arith.constant 0 : i32
    %c0_i32_1 = arith.constant 0 : i32
    return %arg0, %c0_i32, %c0_i32_0 : i32, i32, i32
  }
  func.func @transform_4(%arg0: i32) -> (i32, i32) {
    %c0_i32 = arith.constant 0 : i32
    %c0_i32_0 = arith.constant 0 : i32
    %c0_i32_1 = arith.constant 0 : i32
    return %c0_i32, %c0_i32_0 : i32, i32
  }
  func.func @transform_5(%arg0: i32) -> (i32, i32) {
    %c0_i32 = arith.constant 0 : i32
    %c0_i32_0 = arith.constant 0 : i32
    %c0_i32_1 = arith.constant 0 : i32
    return %c0_i32, %c0_i32_0 : i32, i32
  }
  func.func @transform_6(%arg0: i32) -> (i32, i32) {
    %c0_i32 = arith.constant 0 : i32
    %c0_i32_0 = arith.constant 0 : i32
    %c0_i32_1 = arith.constant 0 : i32
    return %c0_i32, %c0_i32_0 : i32, i32
  }
  func.func @transform_7(%arg0: i32) -> (i32, i32) {
    %c0_i32 = arith.constant 0 : i32
    %c0_i32_0 = arith.constant 0 : i32
    %c0_i32_1 = arith.constant 0 : i32
    return %c0_i32, %c0_i32_0 : i32, i32
  }
  func.func @transform_8(%arg0: i32) -> (i32, i32, i32) {
    %c0_i32 = arith.constant 0 : i32
    %c0_i32_0 = arith.constant 0 : i32
    %c0_i32_1 = arith.constant 0 : i32
    return %arg0, %c0_i32, %c0_i32_0 : i32, i32, i32
  }
  func.func @transform_9(%arg0: i32) -> (i32, i32, i32, i32) {
    %c0_i32 = arith.constant 0 : i32
    %c0_i32_0 = arith.constant 0 : i32
    %c0_i32_1 = arith.constant 0 : i32
    %c0_i32_2 = arith.constant 0 : i32
    return %arg0, %c0_i32, %c0_i32_0, %c0_i32_1 : i32, i32, i32, i32
  }
}

</mosaic_0001>

<bundles_post_ra>
// kernel: tpu_custom_call.1
= control target key start
LH: loop header
LB: loop body
LE: loop exit
PB: predicated region body
PF: predicated region fallthrough
CT: control target
= control target key end

     0   :  { %15 = vsyncpa [#allocation3], 0  ;;  %s3214_s0 = inlined_call_operand.hbm [shape: f32[2,8,32], index: 0, kind: input, shape index: {}]   ;;  %s3215_s1 = inlined_call_operand.hbm [shape: f32[2,8,32], index: 1, kind: input, shape index: {}]   ;;  %s3216_s2 = inlined_call_operand.hbm [shape: f32[2,8,32], index: 2, kind: input, shape index: {}]   ;;  %s3217_s3 = inlined_call_operand.vmem [shape: s8[2,8,8], index: 3, kind: input, shape index: {}]   ;;  %s3218_s4 = inlined_call_operand.hbm [shape: f32[32,32], index: 4, kind: input, shape index: {}]   ;;  %s3219_s5 = inlined_call_operand.hbm [shape: f32[32,32], index: 5, kind: input, shape index: {}]   ;;  %s3220_s6 = inlined_call_operand.hbm [shape: f32[32,32], index: 6, kind: input, shape index: {}]   ;;  %s3221_s7 = inlined_call_operand.hbm [shape: f32[32,32], index: 7, kind: input, shape index: {}]   ;;  %s3222_s8 = inlined_call_operand.hbm [shape: f32[2,8,32], index: 8, kind: output, shape index: {0}]   ;;  %s3223_s9 = inlined_call_operand.hbm [shape: f32[2,4,8,8], index: 9, kind: output, shape index: {1}]  }
   0x1   :  { %16 = vsyncpa [#allocation6], 0 }
   0x2   :  { %17 = vsyncpa [#allocation9], 0 }
   0x3   :  { %18 = vsyncpa [#allocation12], 0 }
   0x4   :  { %19 = vsyncpa [#allocation4], 0 }
   0x5   :  { %20 = vsyncpa [#allocation16], 0  ;;  %s2861_s30 = smov [#allocation5]   ;;  %s2862_s11 = smov [#allocation8]  }
   0x6   :  { %s38_s10 = sshll.u32 %s2861_s30, 4  ;;  %s64_s12 = sshll.u32 %s2862_s11, 4  ;;  %s39_s10 = int_to_ptr.vmem [resolvable:$true] %s38_s10  ;;  %s2924_s12 = int_to_ptr.vmem [resolvable:$true] %s64_s12 }
   0x7   :  { %s2651_s15 = scalar_lea.hbm %s3215_s1, 256 }
   0x8   :  { %p2652_p0 = scmp.ne.s32.totalorder %s3215_s1, %s2651_s15  ;;  %p2655_p1 = scmp.lt.u32.totalorder %s2651_s15, %s3215_s1 }
   0xa   :  { %p2657_p2 = pnand %p2655_p1, %p2652_p0 }
   0xc   :  { %2660 = shalt.err (!%p2657_p2)
}
   0xd   :  { %s2661_s20 = scalar_lea.vmem %s39_s10, 256  ;;  %p2666_p4 = scmp.lt.s32.totalorder %s39_s10, %s39_s10 }
   0xe   :  { %p2662_p3 = scmp.ne.s32.totalorder %s39_s10, %s2661_s20  ;;  %p2667_p5 = scmp.lt.s32.totalorder %s2661_s20, %s2661_s20 }
  0x10   :  { %p2668_p6 = por %p2667_p5, %p2666_p4 }
  0x12   :  { %p2669_p7 = pnand %p2668_p6, %p2662_p3 }
  0x14   :  { %2672 = shalt.err (!%p2669_p7)
}
  0x15   :  { %s2863_s21 = smov 128   ;;  %s2864_s22 = smov 8  }
  0x16   :  { %44 = dma.hbm_to_vmem [thread:$0]  %s3215_s1, 256, %s39_s10, [#allocation6], %s2863_s21, %s2863_s21, %s2864_s22  }
  0x17   :  { %s2673_s27 = scalar_lea.hbm %s3218_s4, 512 }
  0x18   :  { %p2674_p8 = scmp.ne.s32.totalorder %s3218_s4, %s2673_s27  ;;  %p2677_p9 = scmp.lt.u32.totalorder %s2673_s27, %s3218_s4 }
  0x1a   :  { %p2679_p10 = pnand %p2677_p9, %p2674_p8 }
  0x1c   :  { %2682 = shalt.err (!%p2679_p10)
}
  0x1d   :  { %s2683_s13 = scalar_lea.vmem %s2924_s12, 512  ;;  %p2688_p12 = scmp.lt.s32.totalorder %s2924_s12, %s2924_s12 }
  0x1e   :  { %p2684_p11 = scmp.ne.s32.totalorder %s2924_s12, %s2683_s13  ;;  %p2689_p13 = scmp.lt.s32.totalorder %s2683_s13, %s2683_s13 }
  0x20   :  { %p2690_p0 = por %p2689_p13, %p2688_p12 }
  0x22   :  { %p2691_p1 = pnand %p2690_p0, %p2684_p11 }
  0x24   :  { %2694 = shalt.err (!%p2691_p1)
}
  0x25   :  { %70 = dma.hbm_to_vmem [thread:$0]  %s3218_s4, 512, %s2924_s12, [#allocation9], %s2863_s21, %s2863_s21, %s2864_s22  }
  0x26   :  { %s2865_s14 = smov [#allocation11]   ;;  %s2866_s16 = smov [#allocation2]  }
  0x27   :  { %s88_s15 = sshll.u32 %s2865_s14, 4  ;;  %s26_s17 = sshll.u32 %s2866_s16, 4  ;;  %s89_s15 = int_to_ptr.vmem [resolvable:$true] %s88_s15  ;;  %s2961_s17 = int_to_ptr.vmem [resolvable:$true] %s26_s17 }
  0x28   :  { %s2695_s20 = scalar_lea.hbm %s3220_s6, 512 }
  0x29   :  { %p2696_p2 = scmp.ne.s32.totalorder %s3220_s6, %s2695_s20  ;;  %p2699_p3 = scmp.lt.u32.totalorder %s2695_s20, %s3220_s6 }
  0x2b   :  { %p2701_p4 = pnand %p2699_p3, %p2696_p2 }
  0x2d   :  { %2704 = shalt.err (!%p2701_p4)
}
  0x2e   :  { %s2705_s4 = scalar_lea.vmem %s89_s15, 512  ;;  %p2710_p6 = scmp.lt.s32.totalorder %s89_s15, %s89_s15 }
  0x2f   :  { %p2706_p5 = scmp.ne.s32.totalorder %s89_s15, %s2705_s4  ;;  %p2711_p7 = scmp.lt.s32.totalorder %s2705_s4, %s2705_s4 }
  0x31   :  { %p2712_p8 = por %p2711_p7, %p2710_p6 }
  0x33   :  { %p2713_p9 = pnand %p2712_p8, %p2706_p5 }
  0x35   :  { %2716 = shalt.err (!%p2713_p9)
}
  0x36   :  { %94 = dma.hbm_to_vmem [thread:$0]  %s3220_s6, 512, %s89_s15, [#allocation12], %s2863_s21, %s2863_s21, %s2864_s22  }
  0x37   :  { %s2717_s30 = scalar_lea.hbm %s3214_s0, 256 }
  0x38   :  { %p2718_p10 = scmp.ne.s32.totalorder %s3214_s0, %s2717_s30  ;;  %p2721_p11 = scmp.lt.u32.totalorder %s2717_s30, %s3214_s0 }
  0x3a   :  { %p2723_p12 = pnand %p2721_p11, %p2718_p10 }
  0x3c   :  { %2726 = shalt.err (!%p2723_p12)
}
  0x3d   :  { %s2727_s14 = scalar_lea.vmem %s2961_s17, 256  ;;  %p2732_p0 = scmp.lt.s32.totalorder %s2961_s17, %s2961_s17 }
  0x3e   :  { %p2728_p13 = scmp.ne.s32.totalorder %s2961_s17, %s2727_s14  ;;  %p2733_p1 = scmp.lt.s32.totalorder %s2727_s14, %s2727_s14 }
  0x40   :  { %p2734_p2 = por %p2733_p1, %p2732_p0 }
  0x42   :  { %p2735_p3 = pnand %p2734_p2, %p2728_p13 }
  0x44   :  { %2738 = shalt.err (!%p2735_p3)
}
  0x45   :  { %32 = dma.hbm_to_vmem [thread:$0]  %s3214_s0, 256, %s2961_s17, [#allocation3], %s2863_s21, %s2863_s21, %s2864_s22  }
  0x46   :  { %s2867_s16 = smov [#allocation7]   ;;  %s2868_s19 = smov [#allocation10]  }
  0x47   :  { %s50_s18 = sshll.u32 %s2867_s16, 4  ;;  %s76_s20 = sshll.u32 %s2868_s19, 4  ;;  %s51_s18 = int_to_ptr.vmem [resolvable:$true] %s50_s18  ;;  %s2998_s20 = int_to_ptr.vmem [resolvable:$true] %s76_s20 }
  0x48   :  { %s2739_s25 = scalar_lea.hbm %s3216_s2, 256 }
  0x49   :  { %p2740_p4 = scmp.ne.s32.totalorder %s3216_s2, %s2739_s25  ;;  %p2743_p5 = scmp.lt.u32.totalorder %s2739_s25, %s3216_s2 }
  0x4b   :  { %p2745_p6 = pnand %p2743_p5, %p2740_p4 }
  0x4d   :  { %2748 = shalt.err (!%p2745_p6)
}
  0x4e   :  { %s2749_s0 = scalar_lea.vmem %s51_s18, 256  ;;  %p2754_p8 = scmp.lt.s32.totalorder %s51_s18, %s51_s18 }
  0x4f   :  { %p2750_p7 = scmp.ne.s32.totalorder %s51_s18, %s2749_s0  ;;  %p2755_p9 = scmp.lt.s32.totalorder %s2749_s0, %s2749_s0 }
  0x51   :  { %p2756_p10 = por %p2755_p9, %p2754_p8 }
  0x53   :  { %p2757_p11 = pnand %p2756_p10, %p2750_p7 }
  0x55   :  { %2760 = shalt.err (!%p2757_p11)
}
  0x56   :  { %56 = dma.hbm_to_vmem [thread:$0]  %s3216_s2, 256, %s51_s18, [#allocation6], %s2863_s21, %s2863_s21, %s2864_s22  }
  0x57   :  { %s2761_s11 = scalar_lea.hbm %s3219_s5, 512 }
  0x58   :  { %p2762_p12 = scmp.ne.s32.totalorder %s3219_s5, %s2761_s11  ;;  %p2765_p13 = scmp.lt.u32.totalorder %s2761_s11, %s3219_s5 }
  0x5a   :  { %p2767_p0 = pnand %p2765_p13, %p2762_p12 }
  0x5c   :  { %2770 = shalt.err (!%p2767_p0)
}
  0x5d   :  { %s2771_s6 = scalar_lea.vmem %s2998_s20, 512  ;;  %p2776_p2 = scmp.lt.s32.totalorder %s2998_s20, %s2998_s20 }
  0x5e   :  { %p2772_p1 = scmp.ne.s32.totalorder %s2998_s20, %s2771_s6  ;;  %p2777_p3 = scmp.lt.s32.totalorder %s2771_s6, %s2771_s6 }
  0x60   :  { %p2778_p4 = por %p2777_p3, %p2776_p2 }
  0x62   :  { %p2779_p5 = pnand %p2778_p4, %p2772_p1 }
  0x64   :  { %2782 = shalt.err (!%p2779_p5)
}
  0x65   :  { %82 = dma.hbm_to_vmem [thread:$0]  %s3219_s5, 512, %s2998_s20, [#allocation9], %s2863_s21, %s2863_s21, %s2864_s22  }
  0x66   :  { %s2869_s16 = smov [#allocation13]   ;;  %s2783_s24 = scalar_lea.hbm %s3221_s7, 512 }
  0x67   :  { %s100_s18 = sshll.u32 %s2869_s16, 4  ;;  %p2784_p6 = scmp.ne.s32.totalorder %s3221_s7, %s2783_s24  ;;  %s101_s18 = int_to_ptr.vmem [resolvable:$true] %s100_s18 }
  0x68   :  { %p2787_p7 = scmp.lt.u32.totalorder %s2783_s24, %s3221_s7 }
  0x6a   :  { %p2789_p8 = pnand %p2787_p7, %p2784_p6 }
  0x6c   :  { %2792 = shalt.err (!%p2789_p8)
}
  0x6d   :  { %s2793_s27 = scalar_lea.vmem %s101_s18, 512  ;;  %p2798_p10 = scmp.lt.s32.totalorder %s101_s18, %s101_s18 }
  0x6e   :  { %p2794_p9 = scmp.ne.s32.totalorder %s101_s18, %s2793_s27  ;;  %p2799_p11 = scmp.lt.s32.totalorder %s2793_s27, %s2793_s27 }
  0x70   :  { %p2800_p12 = por %p2799_p11, %p2798_p10 }
  0x72   :  { %p2801_p13 = pnand %p2800_p12, %p2794_p9 }
  0x74   :  { %2804 = shalt.err (!%p2801_p13)
}
  0x75   :  { %106 = dma.hbm_to_vmem [thread:$0]  %s3221_s7, 512, %s101_s18, [#allocation12], %s2863_s21, %s2863_s21, %s2864_s22  }
  0x76   :  { %2849 = dma.done.wait [#allocation3], 256  }
  0x77   :  { %2850 = vsyncadd [#allocation3], 4294967040 }
  0x78   :  { %2851 = dma.done.wait [#allocation6], 512  }
  0x79   :  { %2852 = vsyncadd [#allocation6], 4294966784 }
  0x7a   :  { %2853 = dma.done.wait [#allocation9], 1024  }
  0x7b   :  { %2854 = vsyncadd [#allocation9], 4294966272 }
  0x7c   :  { %2855 = dma.done.wait [#allocation12], 1024  }
  0x7d   :  { %2856 = vsyncadd [#allocation12], 4294966272  ;;  %vm138_vm0 = vcmask 261120   ;;  %v134_v0 = vld [vmem:[#allocation8] sm:$0xff]  ;;  %v135_v1 = vld [vmem:[#allocation8 + $0x8] sm:$0xff]  ;;  %v2870_v21 = vmov 0.0  }
  0x7e   :  { %v136_v2 = vld [vmem:[#allocation8 + $0x10] sm:$0xff]  ;;  %v2570_v3 = vpack.c.bf16 %v135_v1, %v134_v0  ;;  %v137_v4 = vld [vmem:[#allocation8 + $0x18] sm:$0xff]  ;;  %v220_v7 = vld [vmem:[#allocation10] sm:$0xff]  ;;  %vm2871_vm1 = vmmov 0   ;;  %vm528_vm2 = vcmask 64512  }
  0x7f   :  { %v3050_v5 = vld [vmem:[#allocation2] sm:$0xff]  ;;  %v2574_v6 = vpack.c.bf16 %v137_v4, %v136_v2  ;;  %v221_v8 = vld [vmem:[#allocation10 + $0x8] sm:$0xff]  ;;  %v223_v11 = vld [vmem:[#allocation10 + $0x18] sm:$0xff] }
  0x80   :  { %2454 = vmatprep.mubr.msk.f32.mxu0 %vm138_vm0, %v3050_v5  ;;  %v222_v9 = vld [vmem:[#allocation10 + $0x10] sm:$0xff]  ;;  %2571 = vmatprep.subr.bf16.mxu0 %v2570_v3  ;;  %v2578_v10 = vpack.c.bf16 %v221_v8, %v220_v7  ;;  %v130_v12 = vld [vmem:[#allocation5] sm:$0xff]  ;;  %v3055_v14 = vld [vmem:[#allocation2 + $0x8] sm:$0xff] }
  0x81   :  { %2573 = vmatpush3.bf16.msra.mxu0 %v2570_v3  ;;  %v2582_v13 = vpack.c.bf16 %v223_v11, %v222_v9  ;;  %2465 = vmatprep.mubr.msk.f32.mxu1 %vm138_vm0, %v130_v12  ;;  %v131_v15 = vld [vmem:[#allocation5 + $0x8] sm:$0xff]  ;;  %v305_v26 = vld [vmem:[#allocation11] sm:$0xff]  ;;  %v307_v28 = vld [vmem:[#allocation11 + $0x10] sm:$0xff] }
  0x82   :  { %2575 = vmatprep.subr.bf16.mxu0 %v2574_v6  ;;  %2579 = vmatprep.subr.bf16.mxu1 %v2578_v10  ;;  %v306_v27 = vld [vmem:[#allocation11 + $0x8] sm:$0xff]  ;;  %v308_v30 = vld [vmem:[#allocation11 + $0x18] sm:$0xff]  ;;  %v132_v31 = vld [vmem:[#allocation7] sm:$0xff] }
  0x83   :  { %2581 = vmatpush3.bf16.msra.mxu1 %v2578_v10  ;;  %v2586_v29 = vpack.c.bf16 %v306_v27, %v305_v26  ;;  %v2590_v33 = vpack.c.bf16 %v308_v30, %v307_v28  ;;  %v133_v34 = vld [vmem:[#allocation7 + $0x8] sm:$0xff]  ;;  %v3093_v44 = vld [vmem:[%s3217_s3] sm:$0xf]   ;;  %s2872_s3 = smov [#allocation15]  }
  0x84   :  { %2583 = vmatprep.subr.bf16.mxu1 %v2582_v13  ;;  %v2388_v45 = vunpack.c.0.s8 %v3093_v44  ;;  %s2335_s17 = sshll.u32 %s2872_s3, 4  ;;  %s2336_s17 = int_to_ptr.vmem [resolvable:$true] %s2335_s17 }
  0x85   :  { %2577 = vmatpush3.bf16.msra.mxu0 %v2574_v6  ;;  %s2805_s28 = scalar_lea.vmem %s2336_s17, 1024  ;;  %p2810_p1 = scmp.lt.s32.totalorder %s2336_s17, %s2336_s17 }
  0x86   :  { %2587 = vmatprep.subr.bf16.mxu0 %v2586_v29  ;;  %v396_v46 = vcvt.s32.f32 %v2388_v45  ;;  %p2806_p0 = scmp.ne.s32.totalorder %s2336_s17, %s2805_s28  ;;  %p2811_p2 = scmp.lt.s32.totalorder %s2805_s28, %s2805_s28 }
  0x87   :  { %2585 = vmatpush3.bf16.msra.mxu1 %v2582_v13 }
  0x88   :  { %2455 = vmatmul.mubr.msk.f32.vlgmr.msra.gmra.mrb[0].mxu0 %vm138_vm0, %v3055_v14  ;;  %2479 = vmatprep.subr.mxu1 %v2870_v21  ;;  %v398_v47 = vmul.f32 -1e+09, %v396_v46  ;;  %p2812_p3 = por %p2811_p2, %p2810_p1 }
  0x89   :  { %2476 = vmatprep.mubr.msk.f32.mxu0 %vm138_vm0, %v132_v31  ;;  %2589 = vmatpush3.bf16.msra.mxu0 %v2586_v29 }
  0x8a   :  { %2466 = vmatmul.mubr.msk.f32.vlgmr.msra.gmra.mrb[0].mxu1 %vm138_vm0, %v131_v15  ;;  %2591 = vmatprep.subr.bf16.mxu0 %v2590_v33  ;;  %p2813_p4 = pnand %p2812_p3, %p2806_p0 }
  0x8b   :  { %2481 = vmatprep.mubr.msk.f32.mxu1 %vm2871_vm1, %v2870_v21 }
  0x8d   :  { %2593 = vmatpush3.bf16.msra.mxu0 %v2590_v33 }
  0x8e   :  { %2499 = vmatprep.subr.mxu0 %v2870_v21 }
  0x90   :  { %2477 = vmatmul.mubr.msk.f32.vlgmr.msra.gmra.mrb[2].mxu0 %vm138_vm0, %v133_v34 }
  0x91   :  { %2501 = vmatprep.mubr.msk.f32.mxu0 %vm2871_vm1, %v2870_v21 }
 0x15b   :  { %v3060_v16 = vpop.f32.mrb[0].mxu0 }
 0x15c   :  { %v211_v17 = vpop.f32.mrb[1].mxu0 }
 0x15d   :  { %v390_v18 = vmul.f32 0.35355338, %v211_v17  ;;  %v3062_v19 = vpop.f32.mrb[0].mxu1 }
 0x15e   :  { %v296_v20 = vpop.f32.mrb[1].mxu1 }
 0x15f   :  { %400 = vxpose.xlu0.b32.start.end [1/1] (short) (narrow) %v390_v18, 32 }
 0x163   :  { %v3088_v42 = vpop.f32.mrb[2].mxu0 }
 0x164   :  { %v381_v43 = vpop.f32.mrb[3].mxu0 }
 0x16c   :  { %432 = vxpose.xlu0.b32.start.end [1/1] (short) (narrow) %v296_v20, 32 }
 0x1df   :  { %v416_v22 = vpop.trf.xlu0 }
 0x1e0   :  { %496 = vxpose.xlu1.b32.start.end [1/1] (short) (narrow) %v416_v22, 8 }
 0x1e3   :  { %v417_v23 = vpop.trf.xlu0 }
 0x1e4   :  { %602 = vxpose.xlu1.b32.start.end [1/1] (short) (narrow) %v417_v23, 8 }
 0x1e7   :  { %v418_v24 = vpop.trf.xlu0 }
 0x1e8   :  { %707 = vxpose.xlu1.b32.start.end [1/1] (short) (narrow) %v418_v24, 8 }
 0x1eb   :  { %v419_v25 = vpop.trf.xlu0 }
 0x1ec   :  { %812 = vxpose.xlu1.b32.start.end [1/1] (short) (narrow) %v419_v25, 8  ;;  %v391_v25 = vmul.f32 0.35355338, %v3060_v16 }
 0x1ef   :  { %v448_v32 = vpop.trf.xlu0 }
 0x1f0   :  { %2480 = vmatpush3.msra.mxu1 %v448_v32 }
 0x1f1   :  { %2484 = vmatprep.subr.mxu1 %v2870_v21 }
 0x1f3   :  { %v449_v35 = vpop.trf.xlu0 }
 0x1f7   :  { %v450_v37 = vpop.trf.xlu0 }
 0x1fb   :  { %v451_v39 = vpop.trf.xlu0 }
 0x260   :  { %v512_v36 = vpop.trf.xlu1 }
 0x261   :  { %2482 = vmatmul.mubr.msk.f32.vlgmr.msra.gmra.mrb[2].mxu1 %vm528_vm2, %v512_v36 }
 0x262   :  { %2485 = vmatpush3.msra.mxu1 %v449_v35  ;;  %2486 = vmatprep.mubr.msk.f32.mxu1 %vm2871_vm1, %v2870_v21 }
 0x263   :  { %2489 = vmatprep.subr.mxu1 %v2870_v21 }
 0x264   :  { %v618_v38 = vpop.trf.xlu1 }
 0x265   :  { %2487 = vmatmul.mubr.msk.f32.vlgmr.msra.gmra.mrb[4].mxu1 %vm528_vm2, %v618_v38 }
 0x266   :  { %2490 = vmatpush3.msra.mxu1 %v450_v37  ;;  %2491 = vmatprep.mubr.msk.f32.mxu1 %vm2871_vm1, %v2870_v21 }
 0x267   :  { %2494 = vmatprep.subr.mxu1 %v2870_v21 }
 0x268   :  { %v723_v40 = vpop.trf.xlu1 }
 0x269   :  { %2492 = vmatmul.mubr.msk.f32.vlgmr.msra.gmra.mrb[6].mxu1 %vm528_vm2, %v723_v40 }
 0x26a   :  { %2495 = vmatpush3.msra.mxu1 %v451_v39  ;;  %2496 = vmatprep.mubr.msk.f32.mxu1 %vm2871_vm1, %v2870_v21 }
 0x26b   :  { %2504 = vmatprep.subr.mxu1 %v2870_v21 }
 0x26c   :  { %v828_v41 = vpop.trf.xlu1 }
 0x26d   :  { %2497 = vmatmul.mubr.msk.f32.vlgmr.msra.gmra.mrb[8].mxu1 %vm528_vm2, %v828_v41 }
 0x26e   :  { %2506 = vmatprep.mubr.msk.f32.mxu1 %vm2871_vm1, %v2870_v21 }
 0x334   :  { %v598_v48 = vpop.f32.mrb[2].mxu1 }
 0x335   :  { %v599_v49 = vadd.f32 %v598_v48, %v398_v47  ;;  %v2483_v50 = vpop.f32.mrb[3].mxu1 }
 0x337   :  { %v917_v51 = vsel %vm528_vm2, %v599_v49, -inf }
 0x338   :  { %918 = vmax.xlane.f32.xlu1 %v917_v51  ;;  %v703_v52 = vpop.f32.mrb[4].mxu1 }
 0x339   :  { %v704_v53 = vadd.f32 %v703_v52, %v398_v47  ;;  %v2488_v54 = vpop.f32.mrb[5].mxu1 }
 0x33b   :  { %v920_v55 = vsel %vm528_vm2, %v704_v53, -inf }
 0x33c   :  { %921 = vmax.xlane.f32.xlu0 %v920_v55  ;;  %v808_v56 = vpop.f32.mrb[6].mxu1 }
 0x33d   :  { %v809_v57 = vadd.f32 %v808_v56, %v398_v47  ;;  %v2493_v58 = vpop.f32.mrb[7].mxu1 }
 0x33f   :  { %v923_v59 = vsel %vm528_vm2, %v809_v57, -inf }
 0x340   :  { %924 = vmax.xlane.f32.xlu1 %v923_v59  ;;  %v913_v60 = vpop.f32.mrb[8].mxu1 }
 0x341   :  { %v914_v61 = vadd.f32 %v913_v60, %v398_v47  ;;  %v2498_v62 = vpop.f32.mrb[9].mxu1 }
 0x342   :  { %v2389_v62 = vunpack.c.1.s8 %v3093_v44 }
 0x343   :  { %v926_v63 = vsel %vm528_vm2, %v914_v61, -inf }
 0x344   :  { %927 = vmax.xlane.f32.xlu1 %v926_v63  ;;  %v397_v63 = vcvt.s32.f32 %v2389_v62 }
 0x369   :  { %464 = vxpose.xlu0.b32.start.end [1/1] (short) (narrow) %v381_v43, 32 }
 0x3c5   :  { %v919_v0 = vpop.xlane.xlu1 %918 }
 0x3c6   :  { %v929_v1 = vsub.f32 %v599_v49, %v919_v0  ;;  %v399_v0 = vmul.f32 -1e+09, %v397_v63 }
 0x3c8   :  { %v933_v2 = vmul.f32 1.442695, %v929_v1 }
 0x3c9   :  { %v922_v3 = vpop.xlane.xlu0 %921 }
 0x3ca   :  { %2615 = vpow2.f32 %v933_v2  ;;  %v930_v4 = vsub.f32 %v704_v53, %v922_v3 }
 0x3cc   :  { %v935_v6 = vmul.f32 1.442695, %v930_v4 }
 0x3cd   :  { %v925_v7 = vpop.xlane.xlu1 %924 }
 0x3ce   :  { %2617 = vpow2.f32 %v935_v6  ;;  %v931_v8 = vsub.f32 %v809_v57, %v925_v7 }
 0x3d0   :  { %v937_v9 = vmul.f32 1.442695, %v931_v8 }
 0x3d1   :  { %v928_v10 = vpop.xlane.xlu1 %927 }
 0x3d2   :  { %2619 = vpow2.f32 %v937_v9  ;;  %v932_v11 = vsub.f32 %v914_v61, %v928_v10 }
 0x3d4   :  { %v2616_v12 = vpop.eup %2615  ;;  %v939_v13 = vmul.f32 1.442695, %v932_v11 }
 0x3d5   :  { %v941_v15 = vsel %vm528_vm2, %v2616_v12, 0.0 }
 0x3d6   :  { %2621 = vpow2.f32 %v939_v13  ;;  %942 = vadd.xlane.f32.xlu1 %v941_v15 }
 0x3d8   :  { %v2618_v17 = vpop.eup %2617 }
 0x3d9   :  { %v944_v18 = vsel %vm528_vm2, %v2618_v17, 0.0 }
 0x3da   :  { %945 = vadd.xlane.f32.xlu1 %v944_v18 }
 0x3dc   :  { %v2620_v20 = vpop.eup %2619 }
 0x3dd   :  { %v947_v22 = vsel %vm528_vm2, %v2620_v20, 0.0 }
 0x3de   :  { %948 = vadd.xlane.f32.xlu1 %v947_v22 }
 0x3e0   :  { %v2622_v23 = vpop.eup %2621 }
 0x3e1   :  { %v950_v24 = vsel %vm528_vm2, %v2622_v23, 0.0 }
 0x3e2   :  { %951 = vadd.xlane.f32.xlu0 %v950_v24 }
 0x3e9   :  { %v480_v26 = vpop.trf.xlu0 }
 0x3ed   :  { %v481_v27 = vpop.trf.xlu0 }
 0x3f1   :  { %v482_v29 = vpop.trf.xlu0 }
 0x3f5   :  { %v483_v31 = vpop.trf.xlu0 }
 0x40f   :  { %1333 = vxpose.xlu0.b32.start.end [1/1] (short) (narrow) %v3062_v19, 32 }
 0x411   :  { %1301 = vxpose.xlu1.b32.start.end [1/1] (short) (narrow) %v391_v25, 32 }
 0x463   :  { %v943_v28 = vpop.xlane.xlu1 %942 }
 0x464   :  { %2623 = vrcp.f32 %v943_v28 }
 0x467   :  { %v946_v30 = vpop.xlane.xlu1 %945 }
 0x468   :  { %2625 = vrcp.f32 %v946_v30 }
 0x46b   :  { %v949_v32 = vpop.xlane.xlu1 %948 }
 0x46c   :  { %2627 = vrcp.f32 %v949_v32 }
 0x46e   :  { %v2624_v33 = vpop.eup %2623 }
 0x46f   :  { %v954_v34 = vmul.f32 %v2624_v33, %v2616_v12  ;;  %v952_v35 = vpop.xlane.xlu0 %951 }
 0x470   :  { %2629 = vrcp.f32 %v952_v35 }
 0x471   :  { %961 = vst.msk [vmem:[#allocation15] sm:$0xff] %vm528_vm2, %v954_v34  ;;  %2500 = vmatpush3.xpose.msk.msra.mxu0 %vm528_vm2, %v954_v34 }
 0x472   :  { %v2626_v16 = vpop.eup %2625  ;;  %2509 = vmatprep.subr.mxu0 %v2870_v21 }
 0x473   :  { %v956_v19 = vmul.f32 %v2626_v16, %v2618_v17 }
 0x474   :  { %2502 = vmatmul.mubr.msk.f32.vlgmr.msra.gmra.mrb[4].mxu0 %vm528_vm2, %v480_v26 }
 0x475   :  { %962 = vst.msk [vmem:[#allocation15 + $0x8] sm:$0xff] %vm528_vm2, %v956_v19  ;;  %2505 = vmatpush3.xpose.msk.msra.mxu1 %vm528_vm2, %v956_v19  ;;  %2511 = vmatprep.mubr.msk.f32.mxu0 %vm2871_vm1, %v2870_v21 }
 0x476   :  { %v2628_v36 = vpop.eup %2627  ;;  %2514 = vmatprep.subr.mxu1 %v2870_v21 }
 0x477   :  { %v958_v37 = vmul.f32 %v2628_v36, %v2620_v20 }
 0x478   :  { %2507 = vmatmul.mubr.msk.f32.vlgmr.msra.gmra.mrb[10].mxu1 %vm528_vm2, %v481_v27 }
 0x479   :  { %963 = vst.msk [vmem:[#allocation15 + $0x10] sm:$0xff] %vm528_vm2, %v958_v37  ;;  %2510 = vmatpush3.xpose.msk.msra.mxu0 %vm528_vm2, %v958_v37  ;;  %2516 = vmatprep.mubr.msk.f32.mxu1 %vm2871_vm1, %v2870_v21 }
 0x47a   :  { %v2630_v38 = vpop.eup %2629  ;;  %2519 = vmatprep.subr.mxu0 %v2870_v21 }
 0x47b   :  { %v960_v39 = vmul.f32 %v2630_v38, %v2622_v23 }
 0x47c   :  { %2512 = vmatmul.mubr.msk.f32.vlgmr.msra.gmra.mrb[6].mxu0 %vm528_vm2, %v482_v29 }
 0x47d   :  { %964 = vst.msk [vmem:[#allocation15 + $0x18] sm:$0xff] %vm528_vm2, %v960_v39  ;;  %2515 = vmatpush3.xpose.msk.msra.mxu1 %vm528_vm2, %v960_v39  ;;  %2521 = vmatprep.mubr.msk.f32.mxu0 %vm2871_vm1, %v2870_v21 }
 0x47e   :  { %2524 = vmatprep.subr.mxu1 %v2870_v21 }
 0x480   :  { %2517 = vmatmul.mubr.msk.f32.vlgmr.msra.gmra.mrb[12].mxu1 %vm528_vm2, %v483_v31 }
 0x481   :  { %2526 = vmatprep.mubr.msk.f32.mxu1 %vm2871_vm1, %v2870_v21 }
 0x48f   :  { %v1349_v40 = vpop.trf.xlu0 }
 0x490   :  { %2520 = vmatpush3.msra.mxu0 %v1349_v40 }
 0x491   :  { %v1317_v41 = vpop.trf.xlu1  ;;  %2529 = vmatprep.subr.mxu0 %v2870_v21 }
 0x492   :  { %1397 = vxpose.xlu1.b32.start.end [1/1] (short) (narrow) %v1317_v41, 8 }
 0x493   :  { %v1350_v43 = vpop.trf.xlu0 }
 0x494   :  { %2525 = vmatpush3.msra.mxu1 %v1350_v43 }
 0x495   :  { %v1318_v45 = vpop.trf.xlu1  ;;  %2534 = vmatprep.subr.mxu1 %v2870_v21 }
 0x496   :  { %1502 = vxpose.xlu0.b32.start.end [1/1] (short) (narrow) %v1318_v45, 8 }
 0x497   :  { %v1351_v48 = vpop.trf.xlu0 }
 0x499   :  { %v1319_v46 = vpop.trf.xlu1 }
 0x49a   :  { %1607 = vxpose.xlu1.b32.start.end [1/1] (short) (narrow) %v1319_v46, 8 }
 0x49b   :  { %v1352_v49 = vpop.trf.xlu0 }
 0x49d   :  { %v1320_v47 = vpop.trf.xlu1 }
 0x49e   :  { %1712 = vxpose.xlu1.b32.start.end [1/1] (short) (narrow) %v1320_v47, 8 }
 0x512   :  { %v1413_v50 = vpop.trf.xlu1 }
 0x513   :  { %2522 = vmatmul.mubr.msk.f32.vlgmr.msra.gmra.mrb[8].mxu0 %vm528_vm2, %v1413_v50 }
 0x514   :  { %2530 = vmatpush3.msra.mxu0 %v1351_v48  ;;  %2531 = vmatprep.mubr.msk.f32.mxu0 %vm2871_vm1, %v2870_v21 }
 0x515   :  { %2539 = vmatprep.subr.mxu0 %v2870_v21 }
 0x516   :  { %v1518_v51 = vpop.trf.xlu0 }
 0x517   :  { %2527 = vmatmul.mubr.msk.f32.vlgmr.msra.gmra.mrb[14].mxu1 %vm528_vm2, %v1518_v51 }
 0x518   :  { %2535 = vmatpush3.msra.mxu1 %v1352_v49  ;;  %2536 = vmatprep.mubr.msk.f32.mxu1 %vm2871_vm1, %v2870_v21 }
 0x519   :  { %2544 = vmatprep.subr.mxu1 %v2870_v21 }
 0x51a   :  { %v1623_v52 = vpop.trf.xlu1 }
 0x51b   :  { %2532 = vmatmul.mubr.msk.f32.vlgmr.msra.gmra.mrb[10].mxu0 %vm528_vm2, %v1623_v52 }
 0x51c   :  { %2541 = vmatprep.mubr.msk.f32.mxu0 %vm2871_vm1, %v2870_v21 }
 0x51e   :  { %v1728_v53 = vpop.trf.xlu1 }
 0x51f   :  { %2537 = vmatmul.mubr.msk.f32.vlgmr.msra.gmra.mrb[16].mxu1 %vm528_vm2, %v1728_v53 }
 0x520   :  { %2546 = vmatprep.mubr.msk.f32.mxu1 %vm2871_vm1, %v2870_v21 }
 0x547   :  { %v1037_v54 = vpop.f32.mrb[4].mxu0 }
 0x548   :  { %v2503_v55 = vpop.f32.mrb[5].mxu0 }
 0x54b   :  { %v1113_v56 = vpop.f32.mrb[10].mxu1 }
 0x54c   :  { %v2508_v57 = vpop.f32.mrb[11].mxu1 }
 0x54d   :  { %v2203_v57 = vld [vmem:[#allocation13 + $0x8] sm:$0xff] }
 0x54f   :  { %v1189_v58 = vpop.f32.mrb[6].mxu0 }
 0x550   :  { %v2513_v59 = vpop.f32.mrb[7].mxu0 }
 0x553   :  { %v1265_v60 = vpop.f32.mrb[12].mxu1 }
 0x554   :  { %v2518_v61 = vpop.f32.mrb[13].mxu1 }
 0x555   :  { %v2205_v61 = vld [vmem:[#allocation13 + $0x18] sm:$0xff] }
 0x5e6   :  { %v1498_v1 = vpop.f32.mrb[8].mxu0 }
 0x5e7   :  { %v1499_v2 = vadd.f32 %v1498_v1, %v399_v0  ;;  %v2523_v3 = vpop.f32.mrb[9].mxu0 }
 0x5e9   :  { %v1817_v4 = vsel %vm528_vm2, %v1499_v2, -inf }
 0x5ea   :  { %1818 = vmax.xlane.f32.xlu1 %v1817_v4  ;;  %v1603_v6 = vpop.f32.mrb[14].mxu1 }
 0x5eb   :  { %v1604_v7 = vadd.f32 %v1603_v6, %v399_v0  ;;  %v2528_v8 = vpop.f32.mrb[15].mxu1 }
 0x5ed   :  { %v1820_v9 = vsel %vm528_vm2, %v1604_v7, -inf }
 0x5ee   :  { %v1708_v10 = vpop.f32.mrb[10].mxu0  ;;  %1821 = vmax.xlane.f32.xlu0 %v1820_v9 }
 0x5ef   :  { %v1709_v11 = vadd.f32 %v1708_v10, %v399_v0  ;;  %v2533_v12 = vpop.f32.mrb[11].mxu0 }
 0x5f1   :  { %v1823_v13 = vsel %vm528_vm2, %v1709_v11, -inf }
 0x5f2   :  { %1824 = vmax.xlane.f32.xlu1 %v1823_v13  ;;  %v1813_v44 = vpop.f32.mrb[16].mxu1 }
 0x5f3   :  { %v1814_v15 = vadd.f32 %v1813_v44, %v399_v0  ;;  %v2538_v17 = vpop.f32.mrb[17].mxu1 }
 0x5f5   :  { %v1826_v18 = vsel %vm528_vm2, %v1814_v15, -inf }
 0x5f6   :  { %1827 = vmax.xlane.f32.xlu1 %v1826_v18 }
 0x677   :  { %v1819_v20 = vpop.xlane.xlu1 %1818 }
 0x678   :  { %v1829_v22 = vsub.f32 %v1499_v2, %v1819_v20 }
 0x67a   :  { %v1833_v23 = vmul.f32 1.442695, %v1829_v22 }
 0x67b   :  { %v1822_v24 = vpop.xlane.xlu0 %1821 }
 0x67c   :  { %2631 = vpow2.f32 %v1833_v23  ;;  %v1830_v25 = vsub.f32 %v1604_v7, %v1822_v24 }
 0x67e   :  { %v1835_v26 = vmul.f32 1.442695, %v1830_v25 }
 0x67f   :  { %v1825_v27 = vpop.xlane.xlu1 %1824 }
 0x680   :  { %2633 = vpow2.f32 %v1835_v26  ;;  %v1831_v28 = vsub.f32 %v1709_v11, %v1825_v27 }
 0x682   :  { %v1837_v29 = vmul.f32 1.442695, %v1831_v28 }
 0x683   :  { %v1828_v30 = vpop.xlane.xlu1 %1827 }
 0x684   :  { %2635 = vpow2.f32 %v1837_v29  ;;  %v1832_v31 = vsub.f32 %v1814_v15, %v1828_v30 }
 0x686   :  { %v2632_v32 = vpop.eup %2631  ;;  %v1839_v33 = vmul.f32 1.442695, %v1832_v31 }
 0x687   :  { %v1841_v34 = vsel %vm528_vm2, %v2632_v32, 0.0 }
 0x688   :  { %2637 = vpow2.f32 %v1839_v33  ;;  %1842 = vadd.xlane.f32.xlu0 %v1841_v34 }
 0x68a   :  { %v2634_v35 = vpop.eup %2633 }
 0x68b   :  { %v1844_v16 = vsel %vm528_vm2, %v2634_v35, 0.0 }
 0x68c   :  { %1845 = vadd.xlane.f32.xlu1 %v1844_v16 }
 0x68e   :  { %v2636_v19 = vpop.eup %2635 }
 0x68f   :  { %v1847_v36 = vsel %vm528_vm2, %v2636_v19, 0.0 }
 0x690   :  { %1848 = vadd.xlane.f32.xlu0 %v1847_v36 }
 0x692   :  { %v2638_v37 = vpop.eup %2637 }
 0x693   :  { %v1850_v38 = vsel %vm528_vm2, %v2638_v37, 0.0 }
 0x694   :  { %1851 = vadd.xlane.f32.xlu1 %v1850_v38 }
 0x6bd   :  { %1365 = vxpose.xlu0.b32.start.end [1/1] (short) (narrow) %v3088_v42, 32 }
 0x6c7   :  { %1269 = vxpose.xlu1.b32.start [1/4] (short) (narrow) %v1037_v54, 8 }
 0x6cb   :  { %1270 = vxpose.xlu1.b32.cont [2/4] (short) (narrow) %v1113_v56, 8  ;;  %v2202_v56 = vld [vmem:[#allocation13] sm:$0xff] }
 0x6cf   :  { %1271 = vxpose.xlu1.b32.cont [3/4] (short) (narrow) %v1189_v58, 8  ;;  %v2204_v58 = vld [vmem:[#allocation13 + $0x10] sm:$0xff] }
 0x6d0   :  { %v2598_v62 = vpack.c.bf16 %v2205_v61, %v2204_v58 }
 0x6d3   :  { %1272 = vxpose.xlu1.b32.end [4/4] (short) (narrow) %v1265_v60, 8  ;;  %v2594_v60 = vpack.c.bf16 %v2203_v57, %v2202_v56 }
 0x715   :  { %v1843_v39 = vpop.xlane.xlu0 %1842 }
 0x716   :  { %2639 = vrcp.f32 %v1843_v39 }
 0x719   :  { %v1846_v40 = vpop.xlane.xlu1 %1845 }
 0x71a   :  { %2641 = vrcp.f32 %v1846_v40 }
 0x71d   :  { %v1849_v41 = vpop.xlane.xlu0 %1848 }
 0x71e   :  { %2643 = vrcp.f32 %v1849_v41 }
 0x720   :  { %v2640_v43 = vpop.eup %2639 }
 0x721   :  { %v1854_v45 = vmul.f32 %v2640_v43, %v2632_v32  ;;  %v1852_v46 = vpop.xlane.xlu1 %1851 }
 0x722   :  { %2645 = vrcp.f32 %v1852_v46 }
 0x723   :  { %1862 = vst.msk [vmem:[#allocation15 + $0x20] sm:$0xff] %vm528_vm2, %v1854_v45  ;;  %2540 = vmatpush3.xpose.msk.msra.mxu0 %vm528_vm2, %v1854_v45 }
 0x724   :  { %v2642_v47 = vpop.eup %2641  ;;  %2549 = vmatprep.subr.mxu0 %v2870_v21 }
 0x725   :  { %v1856_v42 = vmul.f32 %v2642_v47, %v2634_v35 }
 0x727   :  { %1863 = vst.msk [vmem:[#allocation15 + $0x28] sm:$0xff] %vm528_vm2, %v1856_v42  ;;  %2545 = vmatpush3.xpose.msk.msra.mxu1 %vm528_vm2, %v1856_v42 }
 0x728   :  { %v2644_v48 = vpop.eup %2643  ;;  %2554 = vmatprep.subr.mxu1 %v2870_v21 }
 0x729   :  { %v1858_v49 = vmul.f32 %v2644_v48, %v2636_v19 }
 0x72b   :  { %1864 = vst.msk [vmem:[#allocation15 + $0x30] sm:$0xff] %vm528_vm2, %v1858_v49 }
 0x72c   :  { %v2646_v50 = vpop.eup %2645 }
 0x72d   :  { %v1860_v51 = vmul.f32 %v2646_v50, %v2638_v37 }
 0x72f   :  { %1865 = vst.msk [vmem:[#allocation15 + $0x38] sm:$0xff] %vm528_vm2, %v1860_v51 }
 0x73d   :  { %v1381_v52 = vpop.trf.xlu0 }
 0x73e   :  { %2542 = vmatmul.mubr.msk.f32.vlgmr.msra.gmra.mrb[12].mxu0 %vm528_vm2, %v1381_v52 }
 0x73f   :  { %2550 = vmatpush3.xpose.msk.msra.mxu0 %vm528_vm2, %v1858_v49  ;;  %2551 = vmatprep.mubr.msk.f32.mxu0 %vm2871_vm1, %v2870_v21 }
 0x740   :  { %2595 = vmatprep.subr.bf16.mxu0 %v2594_v60 }
 0x741   :  { %v1382_v53 = vpop.trf.xlu0 }
 0x742   :  { %2547 = vmatmul.mubr.msk.f32.vlgmr.msra.gmra.mrb[18].mxu1 %vm528_vm2, %v1382_v53 }
 0x743   :  { %2555 = vmatpush3.xpose.msk.msra.mxu1 %vm528_vm2, %v1860_v51  ;;  %2556 = vmatprep.mubr.msk.f32.mxu1 %vm2871_vm1, %v2870_v21 }
 0x745   :  { %v1383_v54 = vpop.trf.xlu0 }
 0x746   :  { %2552 = vmatmul.mubr.msk.f32.vlgmr.msra.gmra.mrb[14].mxu0 %vm528_vm2, %v1383_v54 }
 0x747   :  { %v1285_v59 = vpop.trf.xlu1  ;;  %2597 = vmatpush3.bf16.msra.mxu0 %v2594_v60 }
 0x748   :  { %2567 = vmatprep.mubr.msk.f32.mxu0 %vm138_vm0, %v1285_v59  ;;  %2599 = vmatprep.subr.bf16.mxu0 %v2598_v62 }
 0x749   :  { %v1384_v55 = vpop.trf.xlu0 }
 0x74a   :  { %2557 = vmatmul.mubr.msk.f32.vlgmr.msra.gmra.mrb[20].mxu1 %vm528_vm2, %v1384_v55 }
 0x74b   :  { %2601 = vmatpush3.bf16.msra.mxu0 %v2598_v62 }
 0x811   :  { %v1938_v21 = vpop.f32.mrb[12].mxu0 }
 0x812   :  { %2170 = vxpose.xlu0.b32.start [1/4] (short) (narrow) %v1938_v21, 8  ;;  %v2543_v63 = vpop.f32.mrb[13].mxu0 }
 0x815   :  { %v2014_v0 = vpop.f32.mrb[18].mxu1 }
 0x816   :  { %2171 = vxpose.xlu0.b32.cont [2/4] (short) (narrow) %v2014_v0, 8  ;;  %v2548_v1 = vpop.f32.mrb[19].mxu1 }
 0x819   :  { %v2090_v2 = vpop.f32.mrb[14].mxu0 }
 0x81a   :  { %v2553_v3 = vpop.f32.mrb[15].mxu0  ;;  %2172 = vxpose.xlu0.b32.cont [3/4] (short) (narrow) %v2090_v2, 8 }
 0x81d   :  { %v2166_v4 = vpop.f32.mrb[20].mxu1 }
 0x81e   :  { %2173 = vxpose.xlu0.b32.end [4/4] (short) (narrow) %v2166_v4, 8  ;;  %v2558_v6 = vpop.f32.mrb[21].mxu1 }
 0x892   :  { %v2186_v7 = vpop.trf.xlu0 }
 0x893   :  { %2568 = vmatmul.mubr.msk.f32.vlgmr.msra.gmra.mrb[16].mxu0 %vm138_vm0, %v2186_v7 }
 0x966   :  { %v2569_v8 = vpop.f32.mrb[16].mxu0 }
 0x967   :  { %v2288_v9 = vadd.f32 %v2569_v8, %v3055_v14  ;;  %v2278_v10 = vpop.f32.mrb[17].mxu0 }
 0x968   :  { %v2287_v11 = vadd.f32 %v2278_v10, %v3050_v5 }
 0x969   :  { %v2292_v12 = vsel %vm138_vm0, %v2288_v9, 0.0 }
 0x96a   :  { %2293 = vadd.xlane.f32.xlu0 %v2292_v12  ;;  %v2289_v13 = vsel %vm138_vm0, %v2287_v11, 0.0 }
 0x96b   :  { %2290 = vadd.xlane.f32.xlu1 %v2289_v13 }
 0x9f7   :  { %v2294_v44 = vpop.xlane.xlu0 %2293 }
 0x9f8   :  { %v2297_v15 = vmul.f32 0.03125, %v2294_v44  ;;  %v2291_v17 = vpop.xlane.xlu1 %2290 }
 0x9f9   :  { %v2296_v18 = vmul.f32 0.03125, %v2291_v17 }
 0x9fa   :  { %v2299_v20 = vsub.f32 %v2288_v9, %v2297_v15 }
 0x9fb   :  { %v2298_v22 = vsub.f32 %v2287_v11, %v2296_v18 }
 0x9fc   :  { %v2301_v25 = vmul.f32 %v2299_v20, %v2299_v20 }
 0x9fd   :  { %v2300_v23 = vmul.f32 %v2298_v22, %v2298_v22 }
 0x9fe   :  { %v2305_v14 = vsel %vm138_vm0, %v2301_v25, 0.0 }
 0x9ff   :  { %v2302_v24 = vsel %vm138_vm0, %v2300_v23, 0.0 }
 0xa00   :  { %2303 = vadd.xlane.f32.xlu1 %v2302_v24 }
 0xa04   :  { %2306 = vadd.xlane.f32.xlu1 %v2305_v14 }
 0xa05   :  { %2816 = shalt.err (!%p2813_p4)
}
 0xa06   :  { %s2817_s11 = scalar_lea.hbm %s3223_s9, 1024 }
 0xa07   :  { %p2818_p5 = scmp.ne.s32.totalorder %s3223_s9, %s2817_s11  ;;  %p2821_p6 = scmp.lt.u32.totalorder %s2817_s11, %s3223_s9 }
 0xa09   :  { %p2823_p7 = pnand %p2821_p6, %p2818_p5 }
 0xa0b   :  { %2826 = shalt.err (!%p2823_p7)
}
 0xa0c   :  { %2341 = dma.vmem_to_hbm [thread:$0]  %s2336_s17, 1024, %s3223_s9, [#allocation16], %s2863_s21, %s2863_s21, %s2864_s22  }
 0xa0d   :  { %s2873_s15 = smov [#allocation14]  }
 0xa0e   :  { %s2323_s16 = sshll.u32 %s2873_s15, 4  ;;  %s2324_s16 = int_to_ptr.vmem [resolvable:$true] %s2323_s16 }
 0xa0f   :  { %s2827_s9 = scalar_lea.vmem %s2324_s16, 256  ;;  %p2832_p9 = scmp.lt.s32.totalorder %s2324_s16, %s2324_s16 }
 0xa10   :  { %p2828_p8 = scmp.ne.s32.totalorder %s2324_s16, %s2827_s9  ;;  %p2833_p10 = scmp.lt.s32.totalorder %s2827_s9, %s2827_s9 }
 0xa12   :  { %p2834_p11 = por %p2833_p10, %p2832_p9 }
 0xa14   :  { %p2835_p12 = pnand %p2834_p11, %p2828_p8 }
 0xa8d   :  { %v2304_v5 = vpop.xlane.xlu1 %2303 }
 0xa8e   :  { %v2308_v26 = vmul.f32 0.03125, %v2304_v5 }
 0xa90   :  { %v2310_v27 = vadd.f32 1e-05, %v2308_v26 }
 0xa91   :  { %v2307_v28 = vpop.xlane.xlu1 %2306 }
 0xa92   :  { %2647 = vrsqrt.f32 %v2310_v27  ;;  %v2309_v29 = vmul.f32 0.03125, %v2307_v28 }
 0xa94   :  { %v2311_v30 = vadd.f32 1e-05, %v2309_v29 }
 0xa96   :  { %2649 = vrsqrt.f32 %v2311_v30 }
 0xa9c   :  { %v2648_v31 = vpop.eup %2647 }
 0xa9d   :  { %v2314_v32 = vmul.f32 %v2648_v31, %v2298_v22 }
 0xa9f   :  { %2316 = vst.msk [vmem:[#allocation14] sm:$0xff] %vm138_vm0, %v2314_v32 }
 0xaa0   :  { %v2650_v33 = vpop.eup %2649 }
 0xaa1   :  { %v2315_v34 = vmul.f32 %v2650_v33, %v2299_v20 }
 0xaa3   :  { %2317 = vst.msk [vmem:[#allocation14 + $0x8] sm:$0xff] %vm138_vm0, %v2315_v34 }
 0xaa4   :  { %2838 = shalt.err (!%p2835_p12)
}
 0xaa5   :  { %s2839_s23 = scalar_lea.hbm %s3222_s8, 256 }
 0xaa6   :  { %p2840_p13 = scmp.ne.s32.totalorder %s3222_s8, %s2839_s23  ;;  %p2843_p0 = scmp.lt.u32.totalorder %s2839_s23, %s3222_s8 }
 0xaa8   :  { %p2845_p1 = pnand %p2843_p0, %p2840_p13 }
 0xaaa   :  { %2848 = shalt.err (!%p2845_p1)
}
 0xaab   :  { %2329 = dma.vmem_to_hbm [thread:$0]  %s2324_s16, 256, %s3222_s8, [#allocation4], %s2863_s21, %s2863_s21, %s2864_s22  }
 0xaac   :  { %2857 = dma.done.wait [#allocation4], 256  }
 0xaad   :  { %2858 = vsyncadd [#allocation4], 4294967040 }
 0xaae   :  { %2859 = dma.done.wait [#allocation16], 1024  }
 0xaaf   :  { %2860 = vsyncadd [#allocation16], 4294966272 }
 0xab0   :  { %2348 = vsyncpa [#allocation3], 1 }
 0xab1   :  { %2349 = vsyncpa [#allocation6], 1 }
 0xab2   :  { %2350 = vsyncpa [#allocation9], 1 }
 0xab3   :  { %2351 = vsyncpa [#allocation12], 1 }
 0xab4   :  { %2352 = vsyncpa [#allocation4], 1 }
 0xab5   :  { %2353 = vsyncpa [#allocation16], 1 }

</bundles_post_ra>
